<compile_context>
chip_gen: v7x
topology: tpu7x:2x2x1
jax: 0.10.0
libtpu: 0.0.40
codegen_flags: <defaults>
</compile_context>

<pallas_src>
import jax
import jax.numpy as jnp
from jax import lax
from jax.experimental import pallas as pl
from jax.experimental.pallas import tpu as pltpu

# --- problem sizes (small, consistent with a YOLOv1 CNNBlock) ---------------
N, C_IN, H, W = 2, 4, 16, 16
C_OUT = 8
KH = KW = 3
PAD = 1            # "same" padding for the 3x3 conv
STRIDE = 1
EPS = 1e-5         # nn.BatchNorm2d default eps
NEG_SLOPE = 0.1    # nn.LeakyReLU(0.1)
HP, WP = H + 2 * PAD, W + 2 * PAD
NHW = N * H * W


def cnn_block_kernel(x_ref, w_ref, gb_ref, o_ref):
    """Fused Conv2d(3x3, pad=1, no bias) + BatchNorm2d(batch stats) + LeakyReLU.

    x_ref:  (N, HP, WP*C_IN)        zero-padded input, channel-minor lanes
    w_ref:  (KH, WP*C_IN, W*C_OUT)  per-kh banded weights (kw folded into band)
    gb_ref: (2, W*C_OUT)            row 0: gamma (lane-tiled), row 1: beta
    o_ref:  (N*H, W*C_OUT)          lane-dense output (row = n*H + h,
                                    lane = w*C_OUT + c_out)
    """
    # ---- convolution: 3 banded matmuls (one per kh), f32 acc in vregs ------
    # The kw shift is inside the banded weight, so every LHS slice is a
    # full-lane-width, lane-aligned slab (no lane realign copies).
    def lhs(kh):
        return x_ref[:, pl.ds(kh, H), :].reshape(N * H, WP * C_IN)

    acc = jnp.dot(lhs(0), w_ref[0], preferred_element_type=jnp.float32)
    for kh in range(1, KH):
        acc = acc + jnp.dot(lhs(kh), w_ref[kh],
                            preferred_element_type=jnp.float32)

    # ---- BatchNorm2d (training semantics: batch mean, biased variance) -----
    # Per-channel stats = sublane reduce over the 32 rows + lane-group reduce
    # over the 16 w-groups (stride C_OUT).  Sum and sum-of-squares are stacked
    # so the 4-roll all-reduce chain runs once; results land already replicated
    # in the tiled lane pattern -> no re-broadcast needed.
    stats = jnp.concatenate(
        [jnp.sum(acc, axis=0, keepdims=True),
         jnp.sum(acc * acc, axis=0, keepdims=True)], axis=0)     # (2, W*C_OUT)
    for shift in (C_OUT, 2 * C_OUT, 4 * C_OUT, 8 * C_OUT):
        stats = stats + pltpu.roll(stats, shift, 1)

    mean = stats[0:1] * (1.0 / NHW)
    var = jnp.maximum(stats[1:2] * (1.0 / NHW) - mean * mean, 0.0)  # clamp >= 0

    gb = gb_ref[...]
    scale = gb[0:1] * lax.rsqrt(var + EPS)      # folded BN affine
    bias = gb[1:2] - mean * scale

    # ---- elementwise tail: BN apply + LeakyReLU(0.1), lane-dense store -----
    y = acc * scale + bias
    o_ref[...] = jnp.where(y > 0, y, NEG_SLOPE * y)


def pack_cnn_block_params(weight_oihw, gamma, beta):
    """One-time parameter packing (hoisted out of the per-call path).

    Returns:
      w_banded: (KH, WP*C_IN, W*C_OUT) -- output column group v only reads
                rows (v+kw)*C_IN + i for kw in [0, KW); value = W[o,i,kh,kw].
      gb:       (2, W*C_OUT) -- BN gamma/beta tiled over the 16 w lane-groups.
    """
    w_hwio = jnp.transpose(weight_oihw, (2, 3, 1, 0)).astype(jnp.float32)
    # sel[kw, p, v] = 1 iff padded column p == v + kw
    sel = ((jnp.arange(WP)[None, :, None] - jnp.arange(W)[None, None, :]) ==
           jnp.arange(KW)[:, None, None]).astype(jnp.float32)       # (KW, WP, W)
    w_banded = jnp.einsum('kpv,hkio->hpivo', sel, w_hwio).reshape(
        KH, WP * C_IN, W * C_OUT)
    gb = jnp.stack([jnp.tile(gamma.astype(jnp.float32), W),
                    jnp.tile(beta.astype(jnp.float32), W)])          # (2, 128)
    return w_banded, gb


def cnn_block(x_nchw, w_banded, gb):
    """Per-call forward.  x in PyTorch NCHW layout; parameters pre-packed."""
    # TODO(synk): at production sizes, fuse the zero-pad into the kernel and
    #             accept NHWC at the API boundary so these layout ops vanish.
    x_nhwc = jnp.transpose(x_nchw, (0, 2, 3, 1)).astype(jnp.float32)
    x_pad = jnp.pad(x_nhwc, ((0, 0), (PAD, PAD), (PAD, PAD), (0, 0)))
    x_packed = x_pad.reshape(N, HP, WP * C_IN)

    out2d = pl.pallas_call(
        cnn_block_kernel,
        out_shape=jax.ShapeDtypeStruct((N * H, W * C_OUT), jnp.float32),
        in_specs=[pl.BlockSpec(memory_space=pltpu.MemorySpace.VMEM)] * 3,
        out_specs=pl.BlockSpec(memory_space=pltpu.MemorySpace.VMEM),
    )(x_packed, w_banded, gb)

    # lane-dense (N*H, W*C_OUT) -> NCHW
    out = out2d.reshape(N, H, W, C_OUT)
    return jnp.transpose(out, (0, 3, 1, 2))


def cnn_block_reference(x_nchw, weight_oihw, gamma, beta):
    """Pure-JAX reference with identical semantics (for verification)."""
    conv = lax.conv_general_dilated(
        x_nchw, weight_oihw, window_strides=(STRIDE, STRIDE),
        padding=((PAD, PAD), (PAD, PAD)),
        dimension_numbers=("NCHW", "OIHW", "NCHW"))
    mean = jnp.mean(conv, axis=(0, 2, 3), keepdims=True)
    var = jnp.var(conv, axis=(0, 2, 3), keepdims=True)             # biased
    xhat = (conv - mean) / jnp.sqrt(var + EPS)
    y = xhat * gamma.reshape(1, -1, 1, 1) + beta.reshape(1, -1, 1, 1)
    return jnp.where(y > 0, y, NEG_SLOPE * y)


if __name__ == "__main__":
    key = jax.random.PRNGKey(0)
    k_x, k_w, k_g, k_b = jax.random.split(key, 4)

    x = jax.random.normal(k_x, (N, C_IN, H, W), dtype=jnp.float32)
    # Conv2d weight (C_out, C_in, KH, KW), no bias (bias=False in the module).
    weight = 0.1 * jax.random.normal(k_w, (C_OUT, C_IN, KH, KW), dtype=jnp.float32)
    # BatchNorm affine params (perturbed so the affine path is exercised).
    gamma = 1.0 + 0.1 * jax.random.normal(k_g, (C_OUT,), dtype=jnp.float32)
    beta = 0.1 * jax.random.normal(k_b, (C_OUT,), dtype=jnp.float32)

    # Parameter packing happens once (module-init analogue), not per forward.
    w_banded, gb = pack_cnn_block_params(weight, gamma, beta)

    cnn_block_jit = jax.jit(cnn_block)
    out = jax.block_until_ready(cnn_block_jit(x, w_banded, gb))

    ref = cnn_block_reference(x, weight, gamma, beta)
    assert out.shape == (N, C_OUT, H, W)
    assert jnp.allclose(out, ref, atol=1e-3, rtol=1e-3), "mismatch vs reference"

    print("KERNEL_OK")
</pallas_src>

<mosaic_0001>
module attributes {stable_mosaic.version = 11 : i64} {
  func.func @cnn_block_kernel(%arg0: memref<2x18x72xf32, #tpu.memory_space<vmem>>, %arg1: memref<3x72x128xf32, #tpu.memory_space<vmem>>, %arg2: memref<2x128xf32, #tpu.memory_space<vmem>>, %arg3: memref<32x128xf32, #tpu.memory_space<vmem>>) attributes {dimension_semantics = [], scalar_prefetch = 0 : i64, scratch_operands = 0 : i64, tpu.core_type = #tpu.core_type<tc>} {
    %c0 = arith.constant 0 : index
    %c0_0 = arith.constant 0 : index
    %c0_1 = arith.constant 0 : index
    %0 = vector.load %arg0[%c0, %c0_0, %c0_1] : memref<2x18x72xf32, #tpu.memory_space<vmem>>, vector<2x16x72xf32>
    %1 = vector.shape_cast %0 : vector<2x16x72xf32> to vector<32x72xf32>
    %c0_2 = arith.constant 0 : index
    %c0_3 = arith.constant 0 : index
    %c0_4 = arith.constant 0 : index
    %2 = vector.load %arg1[%c0_2, %c0_3, %c0_4] : memref<3x72x128xf32, #tpu.memory_space<vmem>>, vector<1x72x128xf32>
    %3 = vector.shape_cast %2 : vector<1x72x128xf32> to vector<72x128xf32>
    %cst = arith.constant dense<0.000000e+00> : vector<32x128xf32>
    %4 = tpu.matmul %1, %3, %cst {dimension_numbers = #tpu.dot_dimension_numbers<[1], [0], [0], [1], [0, 0, 1, 1], [], []>} : vector<32x72xf32>, vector<72x128xf32>, vector<32x128xf32> -> vector<32x128xf32>
    %c0_5 = arith.constant 0 : index
    %c1 = arith.constant 1 : index
    %c0_6 = arith.constant 0 : index
    %5 = vector.load %arg0[%c0_5, %c1, %c0_6] : memref<2x18x72xf32, #tpu.memory_space<vmem>>, vector<2x16x72xf32>
    %6 = vector.shape_cast %5 : vector<2x16x72xf32> to vector<32x72xf32>
    %c1_7 = arith.constant 1 : index
    %c0_8 = arith.constant 0 : index
    %c0_9 = arith.constant 0 : index
    %7 = vector.load %arg1[%c1_7, %c0_8, %c0_9] : memref<3x72x128xf32, #tpu.memory_space<vmem>>, vector<1x72x128xf32>
    %8 = vector.shape_cast %7 : vector<1x72x128xf32> to vector<72x128xf32>
    %cst_10 = arith.constant dense<0.000000e+00> : vector<32x128xf32>
    %9 = tpu.matmul %6, %8, %cst_10 {dimension_numbers = #tpu.dot_dimension_numbers<[1], [0], [0], [1], [0, 0, 1, 1], [], []>} : vector<32x72xf32>, vector<72x128xf32>, vector<32x128xf32> -> vector<32x128xf32>
    %10 = arith.addf %4, %9 : vector<32x128xf32>
    %c0_11 = arith.constant 0 : index
    %c2 = arith.constant 2 : index
    %c0_12 = arith.constant 0 : index
    %11 = vector.load %arg0[%c0_11, %c2, %c0_12] : memref<2x18x72xf32, #tpu.memory_space<vmem>>, vector<2x16x72xf32>
    %12 = vector.shape_cast %11 : vector<2x16x72xf32> to vector<32x72xf32>
    %c2_13 = arith.constant 2 : index
    %c0_14 = arith.constant 0 : index
    %c0_15 = arith.constant 0 : index
    %13 = vector.load %arg1[%c2_13, %c0_14, %c0_15] : memref<3x72x128xf32, #tpu.memory_space<vmem>>, vector<1x72x128xf32>
    %14 = vector.shape_cast %13 : vector<1x72x128xf32> to vector<72x128xf32>
    %cst_16 = arith.constant dense<0.000000e+00> : vector<32x128xf32>
    %15 = tpu.matmul %12, %14, %cst_16 {dimension_numbers = #tpu.dot_dimension_numbers<[1], [0], [0], [1], [0, 0, 1, 1], [], []>} : vector<32x72xf32>, vector<72x128xf32>, vector<32x128xf32> -> vector<32x128xf32>
    %16 = arith.addf %10, %15 : vector<32x128xf32>
    %cst_17 = arith.constant dense<0.000000e+00> : vector<128xf32>
    %17 = vector.multi_reduction <add>, %16, %cst_17 [0] : vector<32x128xf32> to vector<128xf32>
    %18 = vector.shape_cast %17 : vector<128xf32> to vector<1x128xf32>
    %19 = arith.mulf %16, %16 : vector<32x128xf32>
    %cst_18 = arith.constant dense<0.000000e+00> : vector<128xf32>
    %20 = vector.multi_reduction <add>, %19, %cst_18 [0] : vector<32x128xf32> to vector<128xf32>
    %21 = vector.shape_cast %20 : vector<128xf32> to vector<1x128xf32>
    %22 = tpu.concatenate %18, %21 in 0 : vector<1x128xf32>, vector<1x128xf32> -> vector<2x128xf32>
    %c8_i32 = arith.constant 8 : i32
    %23 = tpu.dynamic_rotate %22 by %c8_i32 dim 1 : vector<2x128xf32>, i32 -> vector<2x128xf32>
    %24 = arith.addf %22, %23 : vector<2x128xf32>
    %c16_i32 = arith.constant 16 : i32
    %25 = tpu.dynamic_rotate %24 by %c16_i32 dim 1 : vector<2x128xf32>, i32 -> vector<2x128xf32>
    %26 = arith.addf %24, %25 : vector<2x128xf32>
    %c32_i32 = arith.constant 32 : i32
    %27 = tpu.dynamic_rotate %26 by %c32_i32 dim 1 : vector<2x128xf32>, i32 -> vector<2x128xf32>
    %28 = arith.addf %26, %27 : vector<2x128xf32>
    %c64_i32 = arith.constant 64 : i32
    %29 = tpu.dynamic_rotate %28 by %c64_i32 dim 1 : vector<2x128xf32>, i32 -> vector<2x128xf32>
    %30 = arith.addf %28, %29 : vector<2x128xf32>
    %31 = vector.extract_strided_slice %30 {offsets = [0, 0], sizes = [1, 128], strides = [1, 1]} : vector<2x128xf32> to vector<1x128xf32>
    %cst_19 = arith.constant 0.001953125 : f32
    %32 = vector.broadcast %cst_19 : f32 to vector<1x128xf32>
    %33 = arith.mulf %31, %32 : vector<1x128xf32>
    %34 = vector.extract_strided_slice %30 {offsets = [1, 0], sizes = [1, 128], strides = [1, 1]} : vector<2x128xf32> to vector<1x128xf32>
    %cst_20 = arith.constant 0.001953125 : f32
    %35 = vector.broadcast %cst_20 : f32 to vector<1x128xf32>
    %36 = arith.mulf %34, %35 : vector<1x128xf32>
    %37 = arith.mulf %33, %33 : vector<1x128xf32>
    %38 = arith.subf %36, %37 : vector<1x128xf32>
    %cst_21 = arith.constant 0.000000e+00 : f32
    %39 = vector.broadcast %cst_21 : f32 to vector<1x128xf32>
    %40 = arith.maximumf %38, %39 : vector<1x128xf32>
    %c0_22 = arith.constant 0 : index
    %c0_23 = arith.constant 0 : index
    %41 = vector.load %arg2[%c0_22, %c0_23] : memref<2x128xf32, #tpu.memory_space<vmem>>, vector<2x128xf32>
    %42 = vector.extract_strided_slice %41 {offsets = [0, 0], sizes = [1, 128], strides = [1, 1]} : vector<2x128xf32> to vector<1x128xf32>
    %cst_24 = arith.constant 9.99999974E-6 : f32
    %43 = vector.broadcast %cst_24 : f32 to vector<1x128xf32>
    %44 = arith.addf %40, %43 : vector<1x128xf32>
    %45 = math.rsqrt %44 : vector<1x128xf32>
    %46 = arith.mulf %42, %45 : vector<1x128xf32>
    %47 = vector.extract_strided_slice %41 {offsets = [1, 0], sizes = [1, 128], strides = [1, 1]} : vector<2x128xf32> to vector<1x128xf32>
    %48 = arith.mulf %33, %46 : vector<1x128xf32>
    %49 = arith.subf %47, %48 : vector<1x128xf32>
    %50 = vector.broadcast %46 : vector<1x128xf32> to vector<32x128xf32>
    %51 = arith.mulf %16, %50 : vector<32x128xf32>
    %52 = vector.broadcast %49 : vector<1x128xf32> to vector<32x128xf32>
    %53 = arith.addf %51, %52 : vector<32x128xf32>
    %cst_25 = arith.constant 0.000000e+00 : f32
    %54 = vector.broadcast %cst_25 : f32 to vector<32x128xf32>
    %55 = arith.cmpf ogt, %53, %54 : vector<32x128xf32>
    %cst_26 = arith.constant 1.000000e-01 : f32
    %56 = vector.broadcast %cst_26 : f32 to vector<32x128xf32>
    %57 = arith.mulf %56, %53 : vector<32x128xf32>
    %58 = arith.select %55, %53, %57 : vector<32x128xi1>, vector<32x128xf32>
    %c0_27 = arith.constant 0 : index
    %c0_28 = arith.constant 0 : index
    %59 = vector.load %arg3[%c0_27, %c0_28] : memref<32x128xf32, #tpu.memory_space<vmem>>, vector<32x128xf32>
    tpu.vector_store %arg3[%c0_27, %c0_28], %58 {strides = array<i32>} : memref<32x128xf32, #tpu.memory_space<vmem>>, vector<32x128xf32>,
    return
  }
}

</mosaic_0001>

<bundles_post_ra>
// kernel: cnn_block.1
= control target key start
LH: loop header
LB: loop body
LE: loop exit
PB: predicated region body
PF: predicated region fallthrough
CT: control target
= control target key end

     0   :  { %vm41_vm0 = vcmask 588800   ;;  %vm373_vm1 = vcmask 1040384   ;;  %s657_s9 = smov 32   ;;  %s658_s10 = smov 64   ;;  %s841_s1 = inlined_call_operand.vmem [shape: f32[3,72,128], index: 1, kind: input, shape index: {}]   ;;  %s842_s0 = inlined_call_operand.vmem [shape: f32[2,18,72], index: 0, kind: input, shape index: {}]   ;;  %s843_s2 = inlined_call_operand.vmem [shape: f32[2,128], index: 2, kind: input, shape index: {}]   ;;  %s844_s3 = inlined_call_operand.vmem [shape: f32[32,128], index: 3, kind: output, shape index: {}]  }
   0x1   :  { %v442_v0 = vld [vmem:[%s841_s1 + $0x48] sm:$0xff]  ;;  %v443_v1 = vld [vmem:[%s841_s1 + $0x50] sm:$0xff]  ;;  %v18_v2 = vld [vmem:[%s841_s1] sm:$0xff] }
   0x2   :  { %v583_v3 = vpack.c.bf16 %v443_v1, %v442_v0  ;;  %v19_v4 = vld [vmem:[%s841_s1 + $0x8] sm:$0xff]  ;;  %v444_v5 = vld [vmem:[%s841_s1 + $0x58] sm:$0xff]  ;;  %v445_v6 = vld [vmem:[%s841_s1 + $0x60] sm:$0xff] }
   0x3   :  { %v599_v7 = vpack.c.bf16 %v19_v4, %v18_v2  ;;  %v587_v8 = vpack.c.bf16 %v445_v6, %v444_v5  ;;  %v20_v9 = vld [vmem:[%s841_s1 + $0x10] sm:$0xff]  ;;  %v21_v10 = vld [vmem:[%s841_s1 + $0x18] sm:$0xff]  ;;  %v446_v11 = vld [vmem:[%s841_s1 + $0x68] sm:$0xff] }
   0x4   :  { %584 = vmatprep.subr.bf16.mxu1 %v583_v3  ;;  %v603_v12 = vpack.c.bf16 %v21_v10, %v20_v9  ;;  %v447_v13 = vld [vmem:[%s841_s1 + $0x70] sm:$0xff]  ;;  %v22_v14 = vld [vmem:[%s841_s1 + $0x20] sm:$0xff]  ;;  %v23_v15 = vld [vmem:[%s841_s1 + $0x28] sm:$0xff] }
   0x5   :  { %600 = vmatprep.subr.bf16.mxu0 %v599_v7  ;;  %586 = vmatpush3.bf16.msra.mxu1 %v583_v3  ;;  %v591_v16 = vpack.c.bf16 %v447_v13, %v446_v11  ;;  %v448_v17 = vld [vmem:[%s841_s1 + $0x78] sm:$0xff]  ;;  %v607_v18 = vpack.c.bf16 %v23_v15, %v22_v14  ;;  %v449_v19 = vld [vmem:[%s841_s1 + $0x80] sm:$0xff]  ;;  %v24_v22 = vld [vmem:[%s841_s1 + $0x30] sm:$0xff] }
   0x6   :  { %602 = vmatpush3.bf16.msra.mxu0 %v599_v7  ;;  %588 = vmatprep.subr.bf16.mxu1 %v587_v8  ;;  %v27_v20 = vld [vmem:[%s842_s0 + $0x1] sm:$0xff]  ;;  %v25_v23 = vld [vmem:[%s841_s1 + $0x38] sm:$0xff]  ;;  %v595_v24 = vpack.c.bf16 %v449_v19, %v448_v17  ;;  %v459_v27 = vld [vmem:[%s841_s1 + $0x90] sm:$0xff] }
   0x7   :  { %604 = vmatprep.subr.bf16.mxu0 %v603_v12  ;;  %v14_v21 = vld [vmem:[%s842_s0] sm:$0xff]  ;;  %529 = vmatprep.mubr.msk.f32.mxu1 %vm41_vm0, %v27_v20  ;;  %v611_v25 = vpack.c.bf16 %v25_v23, %v24_v22  ;;  %v450_v26 = vld [vmem:[%s841_s1 + $0x88] sm:$0xff]  ;;  %v460_v28 = vld [vmem:[%s841_s1 + $0x98] sm:$0xff] }
   0x8   :  { %553 = vmatprep.mubr.msk.f32.mxu0 %vm41_vm0, %v14_v21  ;;  %v26_v29 = vld [vmem:[%s841_s1 + $0x40] sm:$0xff]  ;;  %v615_v30 = vpack.c.bf16 %v460_v28, %v459_v27  ;;  %v462_v32 = vld [vmem:[%s841_s1 + $0xa8] sm:$0xff]  ;;  %v463_v36 = vld [vmem:[%s841_s1 + $0xb0] sm:$0xff] }
   0x9   :  { %590 = vmatpush3.bf16.msra.mxu1 %v587_v8  ;;  %v461_v31 = vld [vmem:[%s841_s1 + $0xa0] sm:$0xff]  ;;  %v28_v33 = vld [vmem:[%s842_s0 + $0x9] sm:$0xff]  ;;  %v464_v37 = vld [vmem:[%s841_s1 + $0xb8] sm:$0xff] }
   0xa   :  { %606 = vmatpush3.bf16.msra.mxu0 %v603_v12  ;;  %592 = vmatprep.subr.bf16.mxu1 %v591_v16  ;;  %v15_v34 = vld [vmem:[%s842_s0 + $0x8] sm:$0xff]  ;;  %v619_v35 = vpack.c.bf16 %v462_v32, %v461_v31  ;;  %v29_v38 = vld [vmem:[%s842_s0 + $0x19] sm:$0xff]  ;;  %v623_v41 = vpack.c.bf16 %v464_v37, %v463_v36  ;;  %v467_v48 = vld [vmem:[%s841_s1 + $0xd0] sm:$0xff] }
   0xb   :  { %608 = vmatprep.subr.bf16.mxu0 %v607_v18  ;;  %v16_v39 = vld [vmem:[%s842_s0 + $0x18] sm:$0xff]  ;;  %v30_v40 = vld [vmem:[%s842_s0 + $0x21] sm:$0xff]  ;;  %v237_v50 = vld [vmem:[%s842_s0 + $0xa] sm:$0xff] }
   0xc   :  { %v17_v42 = vld [vmem:[%s842_s0 + $0x20] sm:$0xff]  ;;  %v466_v44 = vld [vmem:[%s841_s1 + $0xc8] sm:$0xff] }
   0xd   :  { %594 = vmatpush3.bf16.msra.mxu1 %v591_v16  ;;  %v465_v43 = vld [vmem:[%s841_s1 + $0xc0] sm:$0xff]  ;;  %s656_s1 = smov 16  }
   0xe   :  { %610 = vmatpush3.bf16.msra.mxu0 %v607_v18  ;;  %596 = vmatprep.subr.bf16.mxu1 %v595_v24  ;;  %v236_v45 = vld [vmem:[%s842_s0 + $0x2] sm:$0xff]  ;;  %v238_v46 = vld [vmem:[%s842_s0 + $0x1a] sm:$0xff]  ;;  %v627_v47 = vpack.c.bf16 %v466_v44, %v465_v43 }
   0xf   :  { %612 = vmatprep.subr.bf16.mxu0 %v611_v25  ;;  %v239_v49 = vld [vmem:[%s842_s0 + $0x22] sm:$0xff]  ;;  %s655_s0 = smov 8   ;;  %v394_v43 = vld [vmem:[%s843_s2] sm:$0x3] }
  0x11   :  { %598 = vmatpush3.bf16.msra.mxu1 %v595_v24 }
  0x12   :  { %614 = vmatpush3.bf16.msra.mxu0 %v611_v25  ;;  %527 = vmatprep.subr.mxu1 %v450_v26 }
  0x13   :  { %551 = vmatprep.subr.mxu0 %v26_v29 }
  0x15   :  { %528 = vmatpush3.msra.mxu1 %v450_v26 }
  0x16   :  { %552 = vmatpush3.msra.mxu0 %v26_v29  ;;  %631 = vmatprep.subr.bf16.mxu1 %v615_v30 }
  0x17   :  { %616 = vmatprep.subr.bf16.mxu0 %v615_v30  ;;  %530 = vmatmul.mubr.msk.f32.vlgmr.msra.gmra.mrb[0].mxu1 %vm41_vm0, %v28_v33 }
  0x18   :  { %554 = vmatmul.mubr.msk.f32.vlgmr.msra.gmra.mrb[0].mxu0 %vm41_vm0, %v15_v34  ;;  %636 = vmatpush3.bf16.msra.mxu1 %v615_v30 }
  0x19   :  { %618 = vmatpush3.bf16.msra.mxu0 %v615_v30  ;;  %632 = vmatprep.subr.bf16.mxu1 %v619_v35 }
  0x1a   :  { %620 = vmatprep.subr.bf16.mxu0 %v619_v35  ;;  %532 = vmatprep.mubr.msk.f32.mxu1 %vm41_vm0, %v29_v38 }
  0x1b   :  { %556 = vmatprep.mubr.msk.f32.mxu0 %vm41_vm0, %v16_v39  ;;  %533 = vmatmul.mubr.msk.f32.gmra.mrb[2].mxu1 %vm41_vm0, %v30_v40  ;;  %v406_v40 = vlaneseq }
  0x1c   :  { %637 = vmatpush3.bf16.msra.mxu1 %v619_v35  ;;  %557 = vmatmul.mubr.msk.f32.gmra.mrb[2].mxu0 %vm41_vm0, %v17_v42 }
  0x1d   :  { %622 = vmatpush3.bf16.msra.mxu0 %v619_v35  ;;  %633 = vmatprep.subr.bf16.mxu1 %v623_v41 }
  0x1e   :  { %624 = vmatprep.subr.bf16.mxu0 %v623_v41  ;;  %577 = vmatprep.mubr.msk.f32.mxu0 %vm41_vm0, %v236_v45 }
  0x1f   :  { %580 = vmatprep.mubr.msk.f32.mxu1 %vm41_vm0, %v238_v46 }
  0x20   :  { %638 = vmatpush3.bf16.msra.mxu1 %v623_v41 }
  0x21   :  { %626 = vmatpush3.bf16.msra.mxu0 %v623_v41  ;;  %634 = vmatprep.subr.bf16.mxu1 %v627_v47  ;;  %v407_v41 = vshrl.u32 %v406_v40, 7 }
  0x22   :  { %628 = vmatprep.subr.bf16.mxu0 %v627_v47 }
  0x23   :  { %v408_v45 = vsub.s32 0, %v407_v41 }
  0x24   :  { %639 = vmatpush3.bf16.msra.mxu1 %v627_v47 }
  0x25   :  { %630 = vmatpush3.bf16.msra.mxu0 %v627_v47  ;;  %635 = vmatprep.subr.mxu1 %v467_v48 }
  0x26   :  { %575 = vmatprep.subr.mxu0 %v467_v48 }
  0x28   :  { %640 = vmatpush3.msra.mxu1 %v467_v48 }
  0x29   :  { %576 = vmatpush3.msra.mxu0 %v467_v48  ;;  %581 = vmatmul.mubr.msk.f32.vlgmr.msra.gmra.mrb[4].mxu1 %vm41_vm0, %v239_v49  ;;  %v416_v49 = vsub.s32 1, %v407_v41 }
  0x2a   :  { %578 = vmatmul.mubr.msk.f32.vlgmr.msra.gmra.mrb[0].mxu0 %vm41_vm0, %v237_v50 }
  0xea   :  { %v531_v51 = vpop.f32.mrb[0].mxu1 }
  0xeb   :  { %v120_v52 = vpop.f32.mrb[1].mxu1 }
  0xee   :  { %v534_v53 = vpop.f32.mrb[2].mxu1 }
  0xef   :  { %v558_v54 = vpop.f32.mrb[2].mxu0  ;;  %v130_v55 = vpop.f32.mrb[3].mxu1 }
  0xf0   :  { %v233_v56 = vadd.f32 %v558_v54, %v534_v53  ;;  %v227_v57 = vpop.f32.mrb[3].mxu0 }
  0xf1   :  { %v228_v58 = vadd.f32 %v227_v57, %v130_v55 }
  0xfc   :  { %v582_v59 = vpop.f32.mrb[4].mxu1 }
  0xfd   :  { %v579_v60 = vpop.f32.mrb[0].mxu0  ;;  %v808_v61 = vadd.f32 %v582_v59, %v233_v56  ;;  %v338_v62 = vpop.f32.mrb[5].mxu1 }
  0xfe   :  { %v810_v63 = vadd.f32 %v579_v60, %v531_v51  ;;  %v328_v0 = vpop.f32.mrb[1].mxu0  ;;  %v812_v1 = vadd.f32 %v338_v62, %v228_v58 }
  0xff   :  { %v642_v2 = vadd.f32 %v328_v0, %v120_v52  ;;  %v363_v9 = vmul.f32 %v808_v61, %v808_v61 }
 0x100   :  { %v361_v3 = vmul.f32 %v810_v63, %v810_v63  ;;  %v362_v8 = vmul.f32 %v812_v1, %v812_v1 }
 0x101   :  { %v351_v4 = vadd.f32 %v642_v2, %v810_v63  ;;  %v360_v5 = vmul.f32 %v642_v2, %v642_v2 }
 0x103   :  { %v364_v6 = vadd.f32 %v361_v3, %v360_v5  ;;  %v352_v7 = vadd.f32 %v351_v4, %v812_v1 }
 0x105   :  { %v353_v10 = vadd.f32 %v352_v7, %v808_v61  ;;  %v365_v11 = vadd.f32 %v364_v6, %v362_v8 }
 0x107   :  { %v354_v12 = vrot.slane %v353_v10, 4  ;;  %v366_v13 = vadd.f32 %v365_v11, %v363_v9 }
 0x109   :  { %v355_v14 = vadd.f32 %v354_v12, %v353_v10  ;;  %v367_v15 = vrot.slane %v366_v13, 4 }
 0x10b   :  { %v356_v16 = vrot.slane %v355_v14, 2  ;;  %v368_v17 = vadd.f32 %v367_v15, %v366_v13 }
 0x10d   :  { %v357_v18 = vadd.f32 %v356_v16, %v355_v14  ;;  %v369_v19 = vrot.slane %v368_v17, 2 }
 0x10f   :  { %v358_v20 = vrot.slane %v357_v18, 1  ;;  %v370_v21 = vadd.f32 %v369_v19, %v368_v17 }
 0x111   :  { %v371_v22 = vrot.slane %v370_v21, 1  ;;  %v359_v23 = vadd.f32 %v358_v20, %v357_v18 }
 0x113   :  { %v372_v24 = vadd.f32 %v371_v22, %v370_v21 }
 0x115   :  { %v374_v25 = vsel %vm373_vm1, %v359_v23, %v372_v24 }
 0x116   :  { %375 = vrot.lane.b32.xlu0 %v374_v25, %s655_s0 }
 0x188   :  { %v376_v26 = vpop.permute.xlu0 %375 }
 0x189   :  { %v377_v27 = vadd.f32 %v376_v26, %v374_v25 }
 0x18b   :  { %378 = vrot.lane.b32.xlu0 %v377_v27, %s656_s1 }
 0x1fd   :  { %v379_v28 = vpop.permute.xlu0 %378 }
 0x1fe   :  { %v380_v29 = vadd.f32 %v379_v28, %v377_v27 }
 0x200   :  { %381 = vrot.lane.b32.xlu1 %v380_v29, %s657_s9 }
 0x272   :  { %v382_v30 = vpop.permute.xlu1 %381 }
 0x273   :  { %v383_v31 = vadd.f32 %v382_v30, %v380_v29 }
 0x275   :  { %384 = vrot.lane.b32.xlu1 %v383_v31, %s658_s10 }
 0x2e7   :  { %v385_v32 = vpop.permute.xlu1 %384 }
 0x2e8   :  { %v386_v33 = vadd.f32 %v385_v32, %v383_v31 }
 0x2ea   :  { %v387_v34 = vmul.f32 0.001953125, %v386_v33 }
 0x2ec   :  { %v388_v35 = vmul.f32 %v387_v34, %v387_v34 }
 0x2ee   :  { %v390_v36 = vrot.slane %v388_v35, 7 }
 0x2f0   :  { %v392_v37 = vsub.f32 %v387_v34, %v390_v36 }
 0x2f2   :  { %v393_v38 = vmax.f32 %v392_v37, 0.0 }
 0x2f4   :  { %v395_v39 = vadd.f32 1e-05, %v393_v38 }
 0x2f6   :  { %653 = vrsqrt.f32 %v395_v39 }
 0x300   :  { %v654_v42 = vpop.eup %653 }
 0x301   :  { %v398_v44 = vrot.slane %v654_v42, 1 }
 0x303   :  { %v400_v46 = vmul.f32 %v398_v44, %v394_v43 }
 0x305   :  { %v401_v47 = vmul.f32 %v400_v46, %v387_v34  ;;  %v409_v48 = vrot.slane %v400_v46, %v408_v45 }
 0x307   :  { %v403_v50 = vrot.slane %v401_v47, 7  ;;  %v410_v52 = vmul.f32 %v642_v2, %v409_v48  ;;  %v411_v53 = vmul.f32 %v810_v63, %v409_v48  ;;  %v412_v54 = vmul.f32 %v409_v48, %v812_v1 }
 0x308   :  { %v413_v55 = vmul.f32 %v409_v48, %v808_v61 }
 0x309   :  { %v405_v51 = vsub.f32 %v394_v43, %v403_v50 }
 0x30b   :  { %v417_v56 = vrot.slane %v405_v51, %v416_v49 }
 0x30d   :  { %v418_v57 = vadd.f32 %v417_v56, %v410_v52  ;;  %v419_v58 = vadd.f32 %v417_v56, %v411_v53  ;;  %v420_v59 = vadd.f32 %v417_v56, %v412_v54  ;;  %v421_v60 = vadd.f32 %v417_v56, %v413_v55 }
 0x30f   :  { %vm422_vm2 = vcmp.gt.f32.partialorder %v418_v57, 0.0  ;;  %vm423_vm3 = vcmp.gt.f32.partialorder %v419_v58, 0.0  ;;  %vm424_vm4 = vcmp.gt.f32.partialorder %v420_v59, 0.0  ;;  %vm425_vm5 = vcmp.gt.f32.partialorder %v421_v60, 0.0 }
 0x310   :  { %v426_v62 = vmul.f32 0.1, %v418_v57  ;;  %v427_v0 = vmul.f32 0.1, %v419_v58  ;;  %v428_v3 = vmul.f32 0.1, %v420_v59 }
 0x311   :  { %v429_v4 = vmul.f32 0.1, %v421_v60 }
 0x312   :  { %v430_v2 = vsel %vm422_vm2, %v418_v57, %v426_v62  ;;  %v431_v5 = vsel %vm423_vm3, %v419_v58, %v427_v0  ;;  %v432_v63 = vsel %vm424_vm4, %v420_v59, %v428_v3 }
 0x313   :  { %v433_v6 = vsel %vm425_vm5, %v421_v60, %v429_v4  ;;  %434 = vst [vmem:[%s844_s3] sm:$0xff] %v430_v2  ;;  %435 = vst [vmem:[%s844_s3 + $0x8] sm:$0xff] %v431_v5 }
 0x314   :  { %436 = vst [vmem:[%s844_s3 + $0x10] sm:$0xff] %v432_v63  ;;  %437 = vst [vmem:[%s844_s3 + $0x18] sm:$0xff] %v433_v6 }

</bundles_post_ra>
